<compile_context>
chip_gen: v5e
topology: v5e:2x2
jax: 0.10.0
libtpu: 0.0.40
codegen_flags: <defaults>
</compile_context>

<pallas_src>
import jax
import jax.numpy as jnp
from jax.experimental import pallas as pl
from jax.experimental.pallas import tpu as pltpu

EPS = 1e-8  # GroupNorm(eps=1e-08) per the spec


# ----------------------------------------------------------------------------
# Fused ConvBlock kernel
# ----------------------------------------------------------------------------
def _make_conv_block_kernel(*, bn, hidden, K, dilation, T, has_residual, eps):
    def prelu(v, a):
        return jnp.where(v >= 0, v, a * v)

    def gnorm(v, gamma, beta):
        # Single-pass GroupNorm(num_groups=1): stats over the whole (C, T') tile.
        n = float(v.shape[0] * v.shape[1])
        s = jnp.sum(v)
        sq = jnp.sum(v * v)
        mean = s / n
        var = sq / n - mean * mean          # biased variance, like PyTorch
        inv = jax.lax.rsqrt(var + eps)
        return (v - mean) * inv * gamma + beta

    def kernel(xp_ref, alphas_ref, w1_ref, b1_ref, g1_ref, be1_ref,
               wd_ref, bd_ref, g2_ref, be2_ref, wo_ref, bo_ref, *out_refs):
        if has_residual:
            res_ref, skip_ref = out_refs
        else:
            (skip_ref,) = out_refs

        a1 = alphas_ref[0]                  # scalar PReLU alphas from SMEM
        a2 = alphas_ref[1]

        xp = xp_ref[0]                      # (bn, Tp), already zero-padded

        # ---- 1x1 conv (MXU) + PReLU + GroupNorm ----
        h = jnp.dot(w1_ref[...], xp, preferred_element_type=jnp.float32)
        h = prelu(h + b1_ref[...], a1)      # (hidden, Tp)
        h = gnorm(h, g1_ref[...], be1_ref[...])

        # ---- depthwise dilated conv (VPU) + PReLU + GroupNorm ----
        wd = wd_ref[...]                                    # (hidden, K)
        taps = [wd[:, j:j + 1] for j in range(K)]           # hoisted tap weights
        acc = jnp.zeros((hidden, T), jnp.float32)
        for j in range(K):                                  # static unroll, K small
            acc = acc + h[:, j * dilation:j * dilation + T] * taps[j]
        acc = prelu(acc + bd_ref[...], a2)
        feat = gnorm(acc, g2_ref[...], be2_ref[...])        # (hidden, T)

        # ---- stacked residual + skip 1x1 convs: ONE MXU matmul ----
        y = jnp.dot(wo_ref[...], feat, preferred_element_type=jnp.float32)
        y = y + bo_ref[...]                                 # (bn+skip, T) or (skip, T)
        if has_residual:
            res_ref[0] = y[:bn, :]
            skip_ref[0] = y[bn:, :]
        else:
            skip_ref[0] = y

    return kernel


def conv_block_forward(x, params, *, kernel_size, dilation, causal=False):
    """x: (B, bn, T) -> (residual (B, bn, T) or None, skip (B, skip, T))."""
    if causal:
        # TODO(synk): causal cLN (cumulative LayerNorm) path not implemented.
        raise NotImplementedError("causal ConvBlock path not implemented")

    B, bn, T = x.shape
    hidden = params["w1"].shape[0]
    skip_ch = params["skip_w"].shape[0]
    has_residual = params.get("res_w") is not None

    pad = (kernel_size - 1) * dilation
    pad_l = pad // 2
    pad_r = pad - pad_l
    Tp = T + pad
    # Single tiny wrapper-side pad (the spec pads before conv_layers).
    xp = jnp.pad(x, ((0, 0), (0, 0), (pad_l, pad_r)))

    alphas = jnp.concatenate([params["a1"], params["a2"]]).astype(jnp.float32)  # (2,)
    if has_residual:
        wo = jnp.concatenate([params["res_w"], params["skip_w"]], axis=0)
        bo = jnp.concatenate([params["res_b"], params["skip_b"]], axis=0)
    else:
        wo, bo = params["skip_w"], params["skip_b"]

    kernel = _make_conv_block_kernel(
        bn=bn, hidden=hidden, K=kernel_size, dilation=dilation, T=T,
        has_residual=has_residual, eps=EPS)

    def _resident(arr):
        # Constant block index -> staged once, stays VMEM-resident over the grid.
        nd = arr.ndim
        return pl.BlockSpec(arr.shape, lambda i: (0,) * nd)

    in_specs = [
        pl.BlockSpec((1, bn, Tp), lambda i: (i, 0, 0)),                  # padded x
        pl.BlockSpec(memory_space=pltpu.MemorySpace.SMEM),               # PReLU alphas
        _resident(params["w1"]), _resident(params["b1"]),
        _resident(params["gn1_g"]), _resident(params["gn1_b"]),
        _resident(params["dw_w"]), _resident(params["dw_b"]),
        _resident(params["gn2_g"]), _resident(params["gn2_b"]),
        _resident(wo), _resident(bo),
    ]

    out_shapes, out_specs = [], []
    if has_residual:
        out_shapes.append(jax.ShapeDtypeStruct((B, bn, T), jnp.float32))
        out_specs.append(pl.BlockSpec((1, bn, T), lambda i: (i, 0, 0)))
    out_shapes.append(jax.ShapeDtypeStruct((B, skip_ch, T), jnp.float32))
    out_specs.append(pl.BlockSpec((1, skip_ch, T), lambda i: (i, 0, 0)))

    outs = pl.pallas_call(
        kernel,
        out_shape=tuple(out_shapes),
        grid=(B,),
        in_specs=in_specs,
        out_specs=tuple(out_specs),
        compiler_params=pltpu.CompilerParams(
            dimension_semantics=("parallel",)),     # v7x: both TensorCores busy
    )(xp, alphas,
      params["w1"], params["b1"], params["gn1_g"], params["gn1_b"],
      params["dw_w"], params["dw_b"], params["gn2_g"], params["gn2_b"], wo, bo)

    if has_residual:
        residual, skip_out = outs
    else:
        residual = None
        skip_out = outs[0] if isinstance(outs, (tuple, list)) else outs
    return residual, skip_out


# ----------------------------------------------------------------------------
# Deterministic parameter init (mirrors the nn.Module parameter shapes)
# ----------------------------------------------------------------------------
def init_params(key, *, bn_channels, skip_channels, hidden_channels, kernel_size,
                no_residual=False):
    ks = iter(jax.random.split(key, 16))

    def w(shape, scale=0.1):
        return (scale * jax.random.normal(next(ks), shape)).astype(jnp.float32)

    return {
        "w1": w((hidden_channels, bn_channels)),            # Conv1d(bn->hidden, k=1)
        "b1": w((hidden_channels, 1), 0.05),
        "a1": jnp.array([0.25], jnp.float32),               # PReLU() default init
        "gn1_g": (1.0 + w((hidden_channels, 1))),           # GroupNorm affine
        "gn1_b": w((hidden_channels, 1), 0.05),
        "dw_w": w((hidden_channels, kernel_size)),           # depthwise conv weight
        "dw_b": w((hidden_channels, 1), 0.05),
        "a2": jnp.array([0.2], jnp.float32),                 # second PReLU
        "gn2_g": (1.0 + w((hidden_channels, 1))),
        "gn2_b": w((hidden_channels, 1), 0.05),
        "res_w": None if no_residual else w((bn_channels, hidden_channels)),
        "res_b": None if no_residual else w((bn_channels, 1), 0.05),
        "skip_w": w((skip_channels, hidden_channels)),
        "skip_b": w((skip_channels, 1), 0.05),
    }


# ----------------------------------------------------------------------------
# Pure-JAX reference (correctness check only)
# ----------------------------------------------------------------------------
def _r_prelu(x, a):
    return jnp.where(x >= 0, x, a * x)


def _r_gn(x, g, b, eps=EPS):
    mean = x.mean(axis=(1, 2), keepdims=True)
    var = ((x - mean) ** 2).mean(axis=(1, 2), keepdims=True)
    return (x - mean) / jnp.sqrt(var + eps) * g[None] + b[None]


def conv_block_ref(x, params, *, kernel_size, dilation):
    K, d = kernel_size, dilation
    B, bn, T = x.shape
    pad = (K - 1) * d
    pad_l = pad // 2
    pad_r = pad - pad_l
    xp = jnp.pad(x, ((0, 0), (0, 0), (pad_l, pad_r)))
    h = jnp.einsum("oc,bct->bot", params["w1"], xp) + params["b1"][None]
    h = _r_prelu(h, params["a1"])
    h = _r_gn(h, params["gn1_g"], params["gn1_b"])
    acc = sum(h[:, :, j * d:j * d + T] * params["dw_w"][:, j][None, :, None]
              for j in range(K))
    acc = _r_prelu(acc + params["dw_b"][None], params["a2"])
    feat = _r_gn(acc, params["gn2_g"], params["gn2_b"])
    res = None
    if params.get("res_w") is not None:
        res = jnp.einsum("oc,bct->bot", params["res_w"], feat) + params["res_b"][None]
    skip = jnp.einsum("oc,bct->bot", params["skip_w"], feat) + params["skip_b"][None]
    return res, skip


# ----------------------------------------------------------------------------
if __name__ == "__main__":
    B = 2
    bn_channels = 16
    skip_channels = 24
    hidden_channels = 32
    kernel_size = 3
    dilation = 2
    T = 128  # lane-dense time axis (multiple of 128)

    key = jax.random.PRNGKey(0)
    key, xkey, pkey = jax.random.split(key, 3)
    x = jax.random.normal(xkey, (B, bn_channels, T), dtype=jnp.float32)
    params = init_params(pkey, bn_channels=bn_channels, skip_channels=skip_channels,
                         hidden_channels=hidden_channels, kernel_size=kernel_size)

    # --- default block (with residual) ---
    res, skip = conv_block_forward(x, params, kernel_size=kernel_size,
                                   dilation=dilation)
    res = jax.block_until_ready(res)
    skip = jax.block_until_ready(skip)
    res_ref, skip_ref = conv_block_ref(x, params, kernel_size=kernel_size,
                                       dilation=dilation)
    assert res.shape == (B, bn_channels, T), res.shape
    assert skip.shape == (B, skip_channels, T), skip.shape
    assert bool(jnp.allclose(res, res_ref, atol=2e-3, rtol=2e-3)), "residual mismatch"
    assert bool(jnp.allclose(skip, skip_ref, atol=2e-3, rtol=2e-3)), "skip mismatch"

    # --- no_residual=True variant (last block of a TCN stack) ---
    params_nr = dict(params, res_w=None, res_b=None)
    res2, skip2 = conv_block_forward(x, params_nr, kernel_size=kernel_size,
                                     dilation=dilation)
    skip2 = jax.block_until_ready(skip2)
    _, skip2_ref = conv_block_ref(x, params_nr, kernel_size=kernel_size,
                                  dilation=dilation)
    assert res2 is None
    assert bool(jnp.allclose(skip2, skip2_ref, atol=2e-3, rtol=2e-3)), \
        "skip (no-residual) mismatch"

    print("KERNEL_OK")
</pallas_src>

<mosaic_0001>
module attributes {stable_mosaic.version = 11 : i64} {
  func.func @kernel(%arg0: i32, %arg1: memref<1x16x132xf32, #tpu.memory_space<vmem>>, %arg2: memref<2xf32, #tpu.memory_space<smem>>, %arg3: memref<32x16xf32, #tpu.memory_space<vmem>>, %arg4: memref<32x1xf32, #tpu.memory_space<vmem>>, %arg5: memref<32x1xf32, #tpu.memory_space<vmem>>, %arg6: memref<32x1xf32, #tpu.memory_space<vmem>>, %arg7: memref<32x3xf32, #tpu.memory_space<vmem>>, %arg8: memref<32x1xf32, #tpu.memory_space<vmem>>, %arg9: memref<32x1xf32, #tpu.memory_space<vmem>>, %arg10: memref<32x1xf32, #tpu.memory_space<vmem>>, %arg11: memref<40x32xf32, #tpu.memory_space<vmem>>, %arg12: memref<40x1xf32, #tpu.memory_space<vmem>>, %arg13: memref<1x16x128xf32, #tpu.memory_space<vmem>>, %arg14: memref<1x24x128xf32, #tpu.memory_space<vmem>>) attributes {dimension_semantics = [#tpu.dimension_semantics<parallel>], iteration_bounds = array<i64: 2>, scalar_prefetch = 0 : i64, scratch_operands = 0 : i64, tpu.core_type = #tpu.core_type<tc>, window_params = [{transform_indices = @transform_0, window_bounds = array<i64: 1, 16, 132>}, {transform_indices = @transform_1, window_bounds = array<i64: 2>}, {pipeline_mode = #tpu.pipeline_mode<synchronous>, transform_indices = @transform_2, window_bounds = array<i64: 32, 16>}, {pipeline_mode = #tpu.pipeline_mode<synchronous>, transform_indices = @transform_3, window_bounds = array<i64: 32, 1>}, {pipeline_mode = #tpu.pipeline_mode<synchronous>, transform_indices = @transform_4, window_bounds = array<i64: 32, 1>}, {pipeline_mode = #tpu.pipeline_mode<synchronous>, transform_indices = @transform_5, window_bounds = array<i64: 32, 1>}, {pipeline_mode = #tpu.pipeline_mode<synchronous>, transform_indices = @transform_6, window_bounds = array<i64: 32, 3>}, {pipeline_mode = #tpu.pipeline_mode<synchronous>, transform_indices = @transform_7, window_bounds = array<i64: 32, 1>}, {pipeline_mode = #tpu.pipeline_mode<synchronous>, transform_indices = @transform_8, window_bounds = array<i64: 32, 1>}, {pipeline_mode = #tpu.pipeline_mode<synchronous>, transform_indices = @transform_9, window_bounds = array<i64: 32, 1>}, {pipeline_mode = #tpu.pipeline_mode<synchronous>, transform_indices = @transform_10, window_bounds = array<i64: 40, 32>}, {pipeline_mode = #tpu.pipeline_mode<synchronous>, transform_indices = @transform_11, window_bounds = array<i64: 40, 1>}, {transform_indices = @transform_12, window_bounds = array<i64: 1, 16, 128>}, {transform_indices = @transform_13, window_bounds = array<i64: 1, 24, 128>}]} {
    %c0 = arith.constant 0 : index
    %0 = memref.load %arg2[%c0] : memref<2xf32, #tpu.memory_space<smem>>
    %c1 = arith.constant 1 : index
    %1 = memref.load %arg2[%c1] : memref<2xf32, #tpu.memory_space<smem>>
    %c0_0 = arith.constant 0 : index
    %c0_1 = arith.constant 0 : index
    %c0_2 = arith.constant 0 : index
    %2 = vector.load %arg1[%c0_0, %c0_1, %c0_2] : memref<1x16x132xf32, #tpu.memory_space<vmem>>, vector<1x16x132xf32>
    %3 = vector.shape_cast %2 : vector<1x16x132xf32> to vector<16x132xf32>
    %c0_3 = arith.constant 0 : index
    %c0_4 = arith.constant 0 : index
    %4 = vector.load %arg3[%c0_3, %c0_4] : memref<32x16xf32, #tpu.memory_space<vmem>>, vector<32x16xf32>
    %cst = arith.constant dense<0.000000e+00> : vector<32x132xf32>
    %5 = tpu.matmul %4, %3, %cst {dimension_numbers = #tpu.dot_dimension_numbers<[1], [0], [0], [1], [0, 0, 1, 1], [], []>} : vector<32x16xf32>, vector<16x132xf32>, vector<32x132xf32> -> vector<32x132xf32>
    %c0_5 = arith.constant 0 : index
    %c0_6 = arith.constant 0 : index
    %6 = vector.load %arg4[%c0_5, %c0_6] : memref<32x1xf32, #tpu.memory_space<vmem>>, vector<32x1xf32>
    %7 = vector.broadcast %6 : vector<32x1xf32> to vector<32x132xf32>
    %8 = arith.addf %5, %7 : vector<32x132xf32>
    %cst_7 = arith.constant 0.000000e+00 : f32
    %9 = vector.broadcast %cst_7 : f32 to vector<32x132xf32>
    %10 = arith.cmpf oge, %8, %9 : vector<32x132xf32>
    %11 = vector.broadcast %0 : f32 to vector<32x132xf32>
    %12 = arith.mulf %11, %8 : vector<32x132xf32>
    %13 = arith.select %10, %8, %12 : vector<32x132xi1>, vector<32x132xf32>
    %c0_8 = arith.constant 0 : index
    %c0_9 = arith.constant 0 : index
    %14 = vector.load %arg5[%c0_8, %c0_9] : memref<32x1xf32, #tpu.memory_space<vmem>>, vector<32x1xf32>
    %c0_10 = arith.constant 0 : index
    %c0_11 = arith.constant 0 : index
    %15 = vector.load %arg6[%c0_10, %c0_11] : memref<32x1xf32, #tpu.memory_space<vmem>>, vector<32x1xf32>
    %16 = vector.shape_cast %13 : vector<32x132xf32> to vector<1x32x132xf32>
    %cst_12 = arith.constant dense<0.000000e+00> : vector<1xf32>
    %17 = vector.multi_reduction <add>, %16, %cst_12 [1, 2] : vector<1x32x132xf32> to vector<1xf32>
    %18 = vector.shape_cast %17 : vector<1xf32> to vector<1x1x1xf32>
    %19 = vector.extract %18[0, 0, 0] : f32 from vector<1x1x1xf32>
    %20 = arith.mulf %13, %13 : vector<32x132xf32>
    %21 = vector.shape_cast %20 : vector<32x132xf32> to vector<1x32x132xf32>
    %cst_13 = arith.constant dense<0.000000e+00> : vector<1xf32>
    %22 = vector.multi_reduction <add>, %21, %cst_13 [1, 2] : vector<1x32x132xf32> to vector<1xf32>
    %23 = vector.shape_cast %22 : vector<1xf32> to vector<1x1x1xf32>
    %24 = vector.extract %23[0, 0, 0] : f32 from vector<1x1x1xf32>
    %cst_14 = arith.constant 4.224000e+03 : f32
    %25 = arith.divf %19, %cst_14 : f32
    %cst_15 = arith.constant 4.224000e+03 : f32
    %26 = arith.divf %24, %cst_15 : f32
    %27 = arith.mulf %25, %25 : f32
    %28 = arith.subf %26, %27 : f32
    %cst_16 = arith.constant 9.99999993E-9 : f32
    %29 = arith.addf %28, %cst_16 : f32
    %30 = math.rsqrt %29 : f32
    %31 = vector.broadcast %25 : f32 to vector<32x132xf32>
    %32 = arith.subf %13, %31 : vector<32x132xf32>
    %33 = vector.broadcast %30 : f32 to vector<32x132xf32>
    %34 = arith.mulf %32, %33 : vector<32x132xf32>
    %35 = vector.broadcast %14 : vector<32x1xf32> to vector<32x132xf32>
    %36 = arith.mulf %34, %35 : vector<32x132xf32>
    %37 = vector.broadcast %15 : vector<32x1xf32> to vector<32x132xf32>
    %38 = arith.addf %36, %37 : vector<32x132xf32>
    %c0_17 = arith.constant 0 : index
    %c0_18 = arith.constant 0 : index
    %39 = vector.load %arg7[%c0_17, %c0_18] : memref<32x3xf32, #tpu.memory_space<vmem>>, vector<32x3xf32>
    %40 = vector.extract_strided_slice %39 {offsets = [0, 0], sizes = [32, 1], strides = [1, 1]} : vector<32x3xf32> to vector<32x1xf32>
    %41 = vector.extract_strided_slice %39 {offsets = [0, 1], sizes = [32, 1], strides = [1, 1]} : vector<32x3xf32> to vector<32x1xf32>
    %42 = vector.extract_strided_slice %39 {offsets = [0, 2], sizes = [32, 1], strides = [1, 1]} : vector<32x3xf32> to vector<32x1xf32>
    %cst_19 = arith.constant 0.000000e+00 : f32
    %43 = vector.broadcast %cst_19 : f32 to vector<32x128xf32>
    %44 = vector.extract_strided_slice %38 {offsets = [0, 0], sizes = [32, 128], strides = [1, 1]} : vector<32x132xf32> to vector<32x128xf32>
    %45 = vector.broadcast %40 : vector<32x1xf32> to vector<32x128xf32>
    %46 = arith.mulf %44, %45 : vector<32x128xf32>
    %47 = arith.addf %43, %46 : vector<32x128xf32>
    %48 = vector.extract_strided_slice %38 {offsets = [0, 2], sizes = [32, 128], strides = [1, 1]} : vector<32x132xf32> to vector<32x128xf32>
    %49 = vector.broadcast %41 : vector<32x1xf32> to vector<32x128xf32>
    %50 = arith.mulf %48, %49 : vector<32x128xf32>
    %51 = arith.addf %47, %50 : vector<32x128xf32>
    %52 = vector.extract_strided_slice %38 {offsets = [0, 4], sizes = [32, 128], strides = [1, 1]} : vector<32x132xf32> to vector<32x128xf32>
    %53 = vector.broadcast %42 : vector<32x1xf32> to vector<32x128xf32>
    %54 = arith.mulf %52, %53 : vector<32x128xf32>
    %55 = arith.addf %51, %54 : vector<32x128xf32>
    %c0_20 = arith.constant 0 : index
    %c0_21 = arith.constant 0 : index
    %56 = vector.load %arg8[%c0_20, %c0_21] : memref<32x1xf32, #tpu.memory_space<vmem>>, vector<32x1xf32>
    %57 = vector.broadcast %56 : vector<32x1xf32> to vector<32x128xf32>
    %58 = arith.addf %55, %57 : vector<32x128xf32>
    %cst_22 = arith.constant 0.000000e+00 : f32
    %59 = vector.broadcast %cst_22 : f32 to vector<32x128xf32>
    %60 = arith.cmpf oge, %58, %59 : vector<32x128xf32>
    %61 = vector.broadcast %1 : f32 to vector<32x128xf32>
    %62 = arith.mulf %61, %58 : vector<32x128xf32>
    %63 = arith.select %60, %58, %62 : vector<32x128xi1>, vector<32x128xf32>
    %c0_23 = arith.constant 0 : index
    %c0_24 = arith.constant 0 : index
    %64 = vector.load %arg9[%c0_23, %c0_24] : memref<32x1xf32, #tpu.memory_space<vmem>>, vector<32x1xf32>
    %c0_25 = arith.constant 0 : index
    %c0_26 = arith.constant 0 : index
    %65 = vector.load %arg10[%c0_25, %c0_26] : memref<32x1xf32, #tpu.memory_space<vmem>>, vector<32x1xf32>
    %66 = vector.shape_cast %63 : vector<32x128xf32> to vector<1x32x128xf32>
    %cst_27 = arith.constant dense<0.000000e+00> : vector<1xf32>
    %67 = vector.multi_reduction <add>, %66, %cst_27 [1, 2] : vector<1x32x128xf32> to vector<1xf32>
    %68 = vector.shape_cast %67 : vector<1xf32> to vector<1x1x1xf32>
    %69 = vector.extract %68[0, 0, 0] : f32 from vector<1x1x1xf32>
    %70 = arith.mulf %63, %63 : vector<32x128xf32>
    %71 = vector.shape_cast %70 : vector<32x128xf32> to vector<1x32x128xf32>
    %cst_28 = arith.constant dense<0.000000e+00> : vector<1xf32>
    %72 = vector.multi_reduction <add>, %71, %cst_28 [1, 2] : vector<1x32x128xf32> to vector<1xf32>
    %73 = vector.shape_cast %72 : vector<1xf32> to vector<1x1x1xf32>
    %74 = vector.extract %73[0, 0, 0] : f32 from vector<1x1x1xf32>
    %cst_29 = arith.constant 4.096000e+03 : f32
    %75 = arith.divf %69, %cst_29 : f32
    %cst_30 = arith.constant 4.096000e+03 : f32
    %76 = arith.divf %74, %cst_30 : f32
    %77 = arith.mulf %75, %75 : f32
    %78 = arith.subf %76, %77 : f32
    %cst_31 = arith.constant 9.99999993E-9 : f32
    %79 = arith.addf %78, %cst_31 : f32
    %80 = math.rsqrt %79 : f32
    %81 = vector.broadcast %75 : f32 to vector<32x128xf32>
    %82 = arith.subf %63, %81 : vector<32x128xf32>
    %83 = vector.broadcast %80 : f32 to vector<32x128xf32>
    %84 = arith.mulf %82, %83 : vector<32x128xf32>
    %85 = vector.broadcast %64 : vector<32x1xf32> to vector<32x128xf32>
    %86 = arith.mulf %84, %85 : vector<32x128xf32>
    %87 = vector.broadcast %65 : vector<32x1xf32> to vector<32x128xf32>
    %88 = arith.addf %86, %87 : vector<32x128xf32>
    %c0_32 = arith.constant 0 : index
    %c0_33 = arith.constant 0 : index
    %89 = vector.load %arg11[%c0_32, %c0_33] : memref<40x32xf32, #tpu.memory_space<vmem>>, vector<40x32xf32>
    %cst_34 = arith.constant dense<0.000000e+00> : vector<40x128xf32>
    %90 = tpu.matmul %89, %88, %cst_34 {dimension_numbers = #tpu.dot_dimension_numbers<[1], [0], [0], [1], [0, 0, 1, 1], [], []>} : vector<40x32xf32>, vector<32x128xf32>, vector<40x128xf32> -> vector<40x128xf32>
    %c0_35 = arith.constant 0 : index
    %c0_36 = arith.constant 0 : index
    %91 = vector.load %arg12[%c0_35, %c0_36] : memref<40x1xf32, #tpu.memory_space<vmem>>, vector<40x1xf32>
    %92 = vector.broadcast %91 : vector<40x1xf32> to vector<40x128xf32>
    %93 = arith.addf %90, %92 : vector<40x128xf32>
    %94 = vector.extract_strided_slice %93 {offsets = [0, 0], sizes = [16, 128], strides = [1, 1]} : vector<40x128xf32> to vector<16x128xf32>
    %c0_37 = arith.constant 0 : index
    %c0_38 = arith.constant 0 : index
    %c0_39 = arith.constant 0 : index
    %95 = vector.load %arg13[%c0_37, %c0_38, %c0_39] : memref<1x16x128xf32, #tpu.memory_space<vmem>>, vector<1x16x128xf32>
    %96 = vector.shape_cast %95 : vector<1x16x128xf32> to vector<16x128xf32>
    %97 = vector.shape_cast %94 : vector<16x128xf32> to vector<1x16x128xf32>
    tpu.vector_store %arg13[%c0_37, %c0_38, %c0_39], %97 {strides = array<i32>} : memref<1x16x128xf32, #tpu.memory_space<vmem>>, vector<1x16x128xf32>,
    %98 = vector.extract_strided_slice %93 {offsets = [16, 0], sizes = [24, 128], strides = [1, 1]} : vector<40x128xf32> to vector<24x128xf32>
    %c0_40 = arith.constant 0 : index
    %c0_41 = arith.constant 0 : index
    %c0_42 = arith.constant 0 : index
    %99 = vector.load %arg14[%c0_40, %c0_41, %c0_42] : memref<1x24x128xf32, #tpu.memory_space<vmem>>, vector<1x24x128xf32>
    %100 = vector.shape_cast %99 : vector<1x24x128xf32> to vector<24x128xf32>
    %101 = vector.shape_cast %98 : vector<24x128xf32> to vector<1x24x128xf32>
    tpu.vector_store %arg14[%c0_40, %c0_41, %c0_42], %101 {strides = array<i32>} : memref<1x24x128xf32, #tpu.memory_space<vmem>>, vector<1x24x128xf32>,
    return
  }
  func.func @transform_0(%arg0: i32) -> (i32, i32, i32) {
    %c0_i32 = arith.constant 0 : i32
    %c0_i32_0 = arith.constant 0 : i32
    %c0_i32_1 = arith.constant 0 : i32
    return %arg0, %c0_i32, %c0_i32_0 : i32, i32, i32
  }
  func.func @transform_1(%arg0: i32) -> i32 {
    %c0_i32 = arith.constant 0 : i32
    %c0_i32_0 = arith.constant 0 : i32
    return %c0_i32 : i32
  }
  func.func @transform_2(%arg0: i32) -> (i32, i32) {
    %c0_i32 = arith.constant 0 : i32
    %c0_i32_0 = arith.constant 0 : i32
    %c0_i32_1 = arith.constant 0 : i32
    return %c0_i32, %c0_i32_0 : i32, i32
  }
  func.func @transform_3(%arg0: i32) -> (i32, i32) {
    %c0_i32 = arith.constant 0 : i32
    %c0_i32_0 = arith.constant 0 : i32
    %c0_i32_1 = arith.constant 0 : i32
    return %c0_i32, %c0_i32_0 : i32, i32
  }
  func.func @transform_4(%arg0: i32) -> (i32, i32) {
    %c0_i32 = arith.constant 0 : i32
    %c0_i32_0 = arith.constant 0 : i32
    %c0_i32_1 = arith.constant 0 : i32
    return %c0_i32, %c0_i32_0 : i32, i32
  }
  func.func @transform_5(%arg0: i32) -> (i32, i32) {
    %c0_i32 = arith.constant 0 : i32
    %c0_i32_0 = arith.constant 0 : i32
    %c0_i32_1 = arith.constant 0 : i32
    return %c0_i32, %c0_i32_0 : i32, i32
  }
  func.func @transform_6(%arg0: i32) -> (i32, i32) {
    %c0_i32 = arith.constant 0 : i32
    %c0_i32_0 = arith.constant 0 : i32
    %c0_i32_1 = arith.constant 0 : i32
    return %c0_i32, %c0_i32_0 : i32, i32
  }
  func.func @transform_7(%arg0: i32) -> (i32, i32) {
    %c0_i32 = arith.constant 0 : i32
    %c0_i32_0 = arith.constant 0 : i32
    %c0_i32_1 = arith.constant 0 : i32
    return %c0_i32, %c0_i32_0 : i32, i32
  }
  func.func @transform_8(%arg0: i32) -> (i32, i32) {
    %c0_i32 = arith.constant 0 : i32
    %c0_i32_0 = arith.constant 0 : i32
    %c0_i32_1 = arith.constant 0 : i32
    return %c0_i32, %c0_i32_0 : i32, i32
  }
  func.func @transform_9(%arg0: i32) -> (i32, i32) {
    %c0_i32 = arith.constant 0 : i32
    %c0_i32_0 = arith.constant 0 : i32
    %c0_i32_1 = arith.constant 0 : i32
    return %c0_i32, %c0_i32_0 : i32, i32
  }
  func.func @transform_10(%arg0: i32) -> (i32, i32) {
    %c0_i32 = arith.constant 0 : i32
    %c0_i32_0 = arith.constant 0 : i32
    %c0_i32_1 = arith.constant 0 : i32
    return %c0_i32, %c0_i32_0 : i32, i32
  }
  func.func @transform_11(%arg0: i32) -> (i32, i32) {
    %c0_i32 = arith.constant 0 : i32
    %c0_i32_0 = arith.constant 0 : i32
    %c0_i32_1 = arith.constant 0 : i32
    return %c0_i32, %c0_i32_0 : i32, i32
  }
  func.func @transform_12(%arg0: i32) -> (i32, i32, i32) {
    %c0_i32 = arith.constant 0 : i32
    %c0_i32_0 = arith.constant 0 : i32
    %c0_i32_1 = arith.constant 0 : i32
    return %arg0, %c0_i32, %c0_i32_0 : i32, i32, i32
  }
  func.func @transform_13(%arg0: i32) -> (i32, i32, i32) {
    %c0_i32 = arith.constant 0 : i32
    %c0_i32_0 = arith.constant 0 : i32
    %c0_i32_1 = arith.constant 0 : i32
    return %arg0, %c0_i32, %c0_i32_0 : i32, i32, i32
  }
}

</mosaic_0001>

<bundles_post_ra>
// kernel: tpu_custom_call.1
= control target key start
LH: loop header
LB: loop body
LE: loop exit
PB: predicated region body
PF: predicated region fallthrough
CT: control target
= control target key end

     0   :  { %s2054_s0 = inlined_call_operand.vmem [shape: f32[2,16,132], index: 0, kind: input, shape index: {}]   ;;  %s2055_s1 = inlined_call_operand.vmem [shape: f32[2], index: 1, kind: input, shape index: {}]   ;;  %s2056_s2 = inlined_call_operand.vmem [shape: f32[32,16], index: 2, kind: input, shape index: {}]   ;;  %s2057_s3 = inlined_call_operand.vmem [shape: f32[32,1], index: 3, kind: input, shape index: {}]   ;;  %s2058_s4 = inlined_call_operand.vmem [shape: f32[32,1], index: 4, kind: input, shape index: {}]   ;;  %s2059_s5 = inlined_call_operand.vmem [shape: f32[32,1], index: 5, kind: input, shape index: {}]   ;;  %s2060_s6 = inlined_call_operand.vmem [shape: f32[32,3], index: 6, kind: input, shape index: {}]   ;;  %s2061_s7 = inlined_call_operand.vmem [shape: f32[32,1], index: 7, kind: input, shape index: {}]   ;;  %s2062_s8 = inlined_call_operand.vmem [shape: f32[32,1], index: 8, kind: input, shape index: {}]   ;;  %s2063_s9 = inlined_call_operand.vmem [shape: f32[32,1], index: 9, kind: input, shape index: {}]   ;;  %s2064_s10 = inlined_call_operand.vmem [shape: f32[40,32], index: 10, kind: input, shape index: {}]   ;;  %s2065_s11 = inlined_call_operand.vmem [shape: f32[40,1], index: 11, kind: input, shape index: {}]   ;;  %s2066_s12 = inlined_call_operand.hbm [shape: f32[2,16,128], index: 12, kind: output, shape index: {0}]   ;;  %s2067_s13 = inlined_call_operand.hbm [shape: f32[2,24,128], index: 13, kind: output, shape index: {1}]  }
   0x1   :  { %2068 = sst [smem:[#allocation12_spill]] %s2054_s0 }
   0x2   :  { %2069 = sst [smem:[#allocation13_spill]] %s2055_s1 }
   0x3   :  { %2070 = sst [smem:[#allocation14_spill]] %s2056_s2 }
   0x4   :  { %2071 = sst [smem:[#allocation15_spill]] %s2057_s3 }
   0x5   :  { %2072 = sst [smem:[#allocation16_spill]] %s2058_s4 }
   0x6   :  { %2073 = sst [smem:[#allocation17_spill]] %s2059_s5 }
   0x7   :  { %2074 = sst [smem:[#allocation18_spill]] %s2060_s6 }
   0x8   :  { %19 = vsyncpa [#allocation4], 0 }
   0x9   :  { %20 = vsyncpa [#allocation3], 0 }
   0xa   :  { %22 = vsyncpa [#allocation3 + $0x1], 0 }
   0xb   :  { %23 = vsyncpa [#allocation7], 0 }
   0xc   :  { %25 = vsyncpa [#allocation7 + $0x1], 0  ;;  %s1644_s25 = smov 0   ;;  %s1646_s26 = smov 0  }
   0xd   :  { %s1648_s27 = smov 0   ;;  %s1650_s28 = smov 0  }
   0xe LB: > { %s1665_s29 = sadd.s32 4294967295, %s1562_s28   ;;  %s1313_s30 = sadd.s32 4294967294, %s1562_s28   ;;  %s1562_s28 = sphi %s1650_s28, %s2089_s28   ;;  %s1558_s27 = sphi %s1648_s27, %s2088_s27   ;;  %s1554_s26 = sphi %s1646_s26, %s2087_s26   ;;  %s1550_s25 = sphi %s1644_s25, %s2086_s25  }
   0xf   : > { %s1669_s14 = sadd.s32 1, %s1562_s28   ;;  %s295_s15 = sadd.s32 1, %s1558_s27 }
  0x10   : > { %s292_s16 = ssub.s32 %s1562_s28, %s1669_s14  ;;  %p305_p0 = scmp.ne.s32.totalorder %s1558_s27, %s1554_s26 }
  0x11   : > { %p293_p1 = scmp.eq.s32.totalorder %s292_s16, 0  ;;  %p306_p2 = scmp.eq.s32.totalorder %s1665_s29, 1 }
  0x12   : > { %p311_p3 = scmp.ne.s32.totalorder %s1554_s26, %s1550_s25  ;;  %p312_p4 = scmp.eq.s32.totalorder %s1313_s30, 1 }
  0x13   : > { %s1680_s17 = scalar_select %p293_p1, %s1558_s27, %s295_s15  }
  0x14   : > { %p1682_p5 = por %p306_p2, %p305_p0  ;;  %p1686_p6 = por %p312_p4, %p311_p3 }
  0x15   : > { %2075 = sst [smem:[#allocation11_spill]] %s1680_s17  ;;  %p1314_p7 = scmp.ge.s32.totalorder %s1562_s28, 1 }
  0x16   : > { %p345_p8 = scmp.lt.s32.totalorder %s1562_s28, 3  ;;  %p1385_p9 = scmp.eq.s32.totalorder %s1665_s29, 0 }
  0x17   : > { %s2078_s1 = sld [smem:[#allocation13_spill]]  ;;  %s1564_s23 = smov [#allocation2]  }
  0x18   : > { %p346_p10 = pnand %p1314_p7, %p345_p8 }
  0x1a   : > { %p1374_p11 = pneg %p346_p10  ;;  %408 = sbr.rel (%p346_p10) target bundleno = 1074 (0x432), region = 68 }
  0x1c   : > { %p1375_p12 = pnand %p1385_p9, %p1374_p11 }
  0x1d   : > { %s357_s22 = sshll.u32 %s2078_s1, 4  ;;  %s358_s22 = int_to_ptr.vmem [resolvable:$true] %s357_s22 }
  0x1e   : > { %1377 = dma.vmem_to_smem (!%p1375_p12), %s358_s22, 16, %s1564_s23, [#allocation4]  }
  0x1f   : > { %1537 = dma.done.wait (%p1385_p9), [#allocation4], 16  }
  0x20   : > { %1539 = vsyncadd (%p1385_p9), [#allocation4], 4294967280 }
  0x21   : > { %415 = sfence }
  0x22   : > { %s2079_s3 = sld [smem:[#allocation15_spill]]  ;;  %p459_p13 = scmp.lt.s32.totalorder %s1665_s29, 1  ;;  %v1565_v1 = vmov 0   ;;  %vm498_vm0 = vcmask 130048   ;;  %vm602_vm3 = vcmask 31744   ;;  %v1566_v33 = vmov 1  }
  0x23   : > { %1431 = vset.pattern.permute.xlu1 %v1565_v1  ;;  %1430 = vset.pattern.permute.xlu0 %v1565_v1  ;;  %s2080_s0 = sld [smem:[#allocation12_spill]]  ;;  %v1567_v53 = vmov 2   ;;  %vm838_vm14 = vcmask 1031168   ;;  %vm899_vm15 = vcmask 1014784  }
  0x24   : > { %s460_s20 = scalar_select %p459_p13, %s1665_s29, 1  ;;  %1432 = vset.pattern.permute.xlu2 %v1565_v1 }
  0x25   : > { %s2081_s2 = sld [smem:[#allocation14_spill]] }
  0x26   : > { %s1342_s21 = sshll.u32 %s460_s20, 5  ;;  %s2082_s4 = sld [smem:[#allocation16_spill]] }
  0x27   : > { %s2083_s5 = sld [smem:[#allocation17_spill]] }
  0x28   : > { %v476_v0 = vld [vmem:[%s2079_s3 + $0x10] sm:$0xff]  ;;  %v474_v2 = vld [vmem:[%s2079_s3] sm:$0xff]  ;;  %v477_v8 = vld [vmem:[%s2079_s3 + $0x18] sm:$0xff]  ;;  %s464_s22 = sld [smem:[#allocation2]] }
  0x29   : > { %490 = vperm.xlu1 %1431, %v476_v0   ;;  %480 = vperm.xlu0 %1430, %v474_v2   ;;  %s463_s24 = scalar_lea.vmem %s2080_s0, %s1342_s21  ;;  %v475_v9 = vld [vmem:[%s2079_s3 + $0x8] sm:$0xff]  ;;  %s2084_s6 = sld [smem:[#allocation18_spill]] }
  0x2a   : > { %v468_v3 = vld [vmem:[%s463_s24 + $0x10] sm:$0xff]  ;;  %v469_v4 = vld [vmem:[%s463_s24 + $0x18] sm:$0xff]  ;;  %v466_v5 = vld [vmem:[%s463_s24] sm:$0xff]  ;;  %s1322_s16 = sld [smem:[#allocation2 + $0x1]] }
  0x2b   : > { %525 = vmatpush.msra.mxu0 %v468_v3  ;;  %554 = vmatpush.msra.mxu1 %v469_v4  ;;  %v467_v6 = vld [vmem:[%s463_s24 + $0x8] sm:$0xff]  ;;  %v470_v7 = vld [vmem:[%s2081_s2] sm:$0xff]  ;;  %v472_v12 = vld [vmem:[%s2081_s2 + $0x10] sm:$0xff] }
  0x2c   : > { %v471_v10 = vld [vmem:[%s2081_s2 + $0x8] sm:$0xff]  ;;  %v473_v14 = vld [vmem:[%s2081_s2 + $0x18] sm:$0xff]  ;;  %s1365_s2 = smul.u32 24, %s1665_s29 }
  0x2d   : > { %526 = vmatpush.msra.mxu0 %v466_v5  ;;  %555 = vmatpush.msra.mxu1 %v467_v6  ;;  %v595_v11 = vld [vmem:[%s2082_s4 + $0x8] sm:$0xff]  ;;  %v600_v15 = vld [vmem:[%s2083_s5 + $0x10] sm:$0xff] }
  0x2e   : > { %1323 = vmatmul.msk.f32.vlgmr.msra.gmra.mxu0 %vm498_vm0, %v470_v7  ;;  %1327 = vmatmul.msk.f32.vlgmr.msra.gmra.mxu1 %vm498_vm0, %v470_v7  ;;  %v599_v13 = vld [vmem:[%s2083_s5 + $0x8] sm:$0xff]  ;;  %v1745_v20 = vstv %s464_s22  ;;  %s1202_s3 = scalar_lea.hbm %s2067_s13, %s1365_s2 }
  0x2f   : > { %v1754_v30 = vld [vmem:[%s2084_s6] sm:$0xff]  ;;  %v1761_v34 = vld [vmem:[%s2084_s6 + $0x8] sm:$0xff] }
  0x31   : > { %495 = vperm.xlu1 %1431, %v477_v8   ;;  %485 = vperm.xlu0 %1430, %v475_v9   ;;  %v594_v9 = vld [vmem:[%s2082_s4] sm:$0xff] }
  0x36   : > { %1324 = vmatmul.msk.f32.gmra.mxu0 %vm498_vm0, %v471_v10  ;;  %1328 = vmatmul.msk.f32.gmra.mxu1 %vm498_vm0, %v471_v10 }
  0x39   : > { %709 = vperm.xlu1 %1431, %v595_v11   ;;  %1433 = vset.pattern.permute.xlu0 %v1566_v33 }
  0x3a   : > { %791 = vperm.xlu0 %1433, %v1754_v30  }
  0x3e   : > { %1325 = vmatmul.msk.f32.gmra.mxu0 %vm498_vm0, %v472_v12  ;;  %1329 = vmatmul.msk.f32.gmra.mxu1 %vm498_vm0, %v472_v12 }
  0x41   : > { %737 = vperm.xlu1 %1431, %v599_v13  }
  0x42   : > { %1436 = vset.pattern.permute.xlu0 %v1567_v53 }
  0x43   : > { %856 = vperm.xlu0 %1436, %v1761_v34  }
  0x46   : > { %1326 = vmatmul.msk.f32.gmra.mxu0 %vm498_vm0, %v473_v14  ;;  %1330 = vmatmul.msk.f32.gmra.mxu1 %vm498_vm0, %v473_v14 }
  0x49   : > { %742 = vperm.xlu1 %1431, %v600_v15  }
  0x4b   : > { %1437 = vset.pattern.permute.xlu0 %v1565_v1 }
  0x4c   : > { %704 = vperm.xlu0 %1437, %v594_v9  }
  0x51   : > { %1434 = vset.pattern.permute.xlu1 %v1566_v33  ;;  %v912_v33 = vld [vmem:[%s2061_s7] sm:$0xff] }
  0x52   : > { %795 = vperm.xlu1 %1434, %v1761_v34  }
  0x9b   : > { %v481_v16 = vpop.permute.xlu0 %480  ;;  %v491_v35 = vpop.permute.xlu1 %490 }
  0xa3   : > { %v486_v23 = vpop.permute.xlu0 %485  ;;  %v496_v59 = vpop.permute.xlu1 %495 }
  0xab   : > { %v528_v17 = vpop.f32.mrf.mxu0  ;;  %v557_v18 = vpop.f32.mrf.mxu1 }
  0xac   : > { %v558_v19 = vadd.f32 %v557_v18, %v481_v16  ;;  %v529_v21 = vadd.f32 %v528_v17, %v481_v16 }
  0xae   : > { %v579_v22 = vmul.f32 %v1745_v20, %v558_v19  ;;  %vm570_vm1 = vcmp.ge.f32.partialorder %v558_v19, 0.0  ;;  %v578_v26 = vmul.f32 %v1745_v20, %v529_v21  ;;  %vm569_vm2 = vcmp.ge.f32.partialorder %v529_v21, 0.0 }
  0xb0   : > { %v1749_v29 = vsel %vm570_vm1, %v558_v19, %v579_v22  ;;  %v1765_v36 = vsel %vm569_vm2, %v529_v21, %v578_v26  ;;  %v598_v22 = vld [vmem:[%s2083_s5] sm:$0xff]  ;;  %v597_v26 = vld [vmem:[%s2082_s4 + $0x18] sm:$0xff] }
  0xb1   : > { %v603_v37 = vsel %vm602_vm3, %v1749_v29, 0.0  ;;  %v624_v38 = vmul.f32 %v1749_v29, %v1749_v29  ;;  %v623_v46 = vmul.f32 %v1765_v36, %v1765_v36  ;;  %732 = vperm.xlu0 %1437, %v598_v22  }
  0xb2   : > { %v604_v41 = vadd.f32 %v603_v37, %v1765_v36 }
  0xb3   : > { %v531_v24 = vpop.f32.mrf.mxu0  ;;  %v560_v25 = vpop.f32.mrf.mxu1  ;;  %v631_v47 = vsel %vm602_vm3, %v624_v38, 0.0 }
  0xb4   : > { %v532_v27 = vadd.f32 %v531_v24, %v486_v23  ;;  %v561_v28 = vadd.f32 %v560_v25, %v486_v23  ;;  %v632_v56 = vadd.f32 %v631_v47, %v623_v46 }
  0xb6   : > { %v580_v31 = vmul.f32 %v1745_v20, %v532_v27  ;;  %v581_v32 = vmul.f32 %v1745_v20, %v561_v28  ;;  %vm571_vm4 = vcmp.ge.f32.partialorder %v532_v27, 0.0  ;;  %vm572_vm5 = vcmp.ge.f32.partialorder %v561_v28, 0.0 }
  0xb8   : > { %v1771_v39 = vsel %vm571_vm4, %v532_v27, %v580_v31  ;;  %v1773_v40 = vsel %vm572_vm5, %v561_v28, %v581_v32  ;;  %v760_v27 = vld [vmem:[%s2084_s6 + $0x10] sm:$0xff]  ;;  %v761_v28 = vld [vmem:[%s2084_s6 + $0x18] sm:$0xff]  ;;  %v1568_v32 = vmov 4224.0  }
  0xb9   : > { %v605_v48 = vadd.f32 %v604_v41, %v1771_v39  ;;  %v606_v49 = vsel %vm602_vm3, %v1773_v40, 0.0  ;;  %v625_v52 = vmul.f32 %v1771_v39, %v1771_v39  ;;  %v626_v54 = vmul.f32 %v1773_v40, %v1773_v40  ;;  %719 = vperm.xlu0 %1437, %v597_v26   ;;  %799 = vperm.xlu1 %1434, %v760_v27   ;;  %v596_v31 = vld [vmem:[%s2082_s4 + $0x10] sm:$0xff] }
  0xba   : > { %1441 = vrcp.f32 %v1568_v32 }
  0xbb   : > { %v534_v42 = vpop.f32.mrf.mxu0  ;;  %v563_v43 = vpop.f32.mrf.mxu1  ;;  %v607_v58 = vadd.f32 %v606_v49, %v605_v48  ;;  %v633_v60 = vadd.f32 %v632_v56, %v625_v52  ;;  %v634_v0 = vsel %vm602_vm3, %v626_v54, 0.0 }
  0xbc   : > { %v535_v44 = vadd.f32 %v534_v42, %v491_v35  ;;  %v564_v45 = vadd.f32 %v563_v43, %v491_v35 }
  0xbd   : > { %v635_v11 = vadd.f32 %v634_v0, %v633_v60  ;;  %v913_v60 = vld [vmem:[%s2061_s7 + $0x8] sm:$0xff] }
  0xbe   : > { %vm573_vm6 = vcmp.ge.f32.partialorder %v535_v44, 0.0  ;;  %v582_v50 = vmul.f32 %v1745_v20, %v535_v44  ;;  %vm574_vm7 = vcmp.ge.f32.partialorder %v564_v45, 0.0  ;;  %v583_v51 = vmul.f32 %v1745_v20, %v564_v45 }
  0xc0   : > { %v1789_v55 = vsel %vm573_vm6, %v535_v44, %v582_v50  ;;  %v1792_v57 = vsel %vm574_vm7, %v564_v45, %v583_v51  ;;  %v1442_v35 = vpop.eup %1441 }
  0xc1   : > { %v608_v63 = vadd.f32 %v607_v58, %v1789_v55  ;;  %v609_v4 = vsel %vm602_vm3, %v1792_v57, 0.0  ;;  %v627_v5 = vmul.f32 %v1789_v55, %v1789_v55  ;;  %v628_v6 = vmul.f32 %v1792_v57, %v1792_v57  ;;  %769 = vperm.xlu0 %1437, %v1761_v34   ;;  %803 = vperm.xlu1 %1434, %v761_v28   ;;  %v601_v34 = vld [vmem:[%s2083_s5 + $0x18] sm:$0xff] }
  0xc2   : > { %v652_v42 = vmul.f32 4224.0, %v1442_v35  ;;  %vm656_vm10 = vweird.f32 %v1442_v35 }
  0xc3   : > { %v537_v61 = vpop.f32.mrf.mxu0  ;;  %v566_v62 = vpop.f32.mrf.mxu1  ;;  %v610_v10 = vadd.f32 %v609_v4, %v608_v63  ;;  %v636_v16 = vadd.f32 %v635_v11, %v627_v5  ;;  %v637_v17 = vsel %vm602_vm3, %v628_v6, 0.0 }
  0xc4   : > { %v538_v2 = vadd.f32 %v537_v61, %v496_v59  ;;  %v567_v3 = vadd.f32 %v566_v62, %v496_v59  ;;  %v653_v45 = vsub.f32 1.0, %v652_v42  ;;  %v710_v4 = vpop.permute.xlu1 %709  ;;  %v792_v5 = vpop.permute.xlu0 %791 }
  0xc5   : > { %v638_v21 = vadd.f32 %v637_v17, %v636_v16 }
  0xc6   : > { %vm575_vm8 = vcmp.ge.f32.partialorder %v538_v2, 0.0  ;;  %v584_v7 = vmul.f32 %v1745_v20, %v538_v2  ;;  %vm576_vm9 = vcmp.ge.f32.partialorder %v567_v3, 0.0  ;;  %v585_v8 = vmul.f32 %v1745_v20, %v567_v3 }
  0xc7   : > { %v654_v51 = vmul.f32 %v1442_v35, %v653_v45 }
  0xc8   : > { %v1807_v12 = vsel %vm575_vm8, %v538_v2, %v584_v7  ;;  %v1809_v13 = vsel %vm576_vm9, %v567_v3, %v585_v8  ;;  %vm1115_vm8 = vcmask 261120  }
  0xc9   : > { %v611_v14 = vadd.f32 %v610_v10, %v1807_v12  ;;  %v612_v15 = vsel %vm602_vm3, %v1809_v13, 0.0  ;;  %v629_v19 = vmul.f32 %v1807_v12, %v1807_v12  ;;  %v630_v20 = vmul.f32 %v1809_v13, %v1809_v13  ;;  %774 = vperm.xlu0 %1437, %v760_v27   ;;  %1438 = vset.pattern.permute.xlu1 %v1567_v53 }
  0xca   : > { %864 = vperm.xlu1 %1438, %v761_v28   ;;  %v655_v56 = vadd.f32 %v1442_v35, %v654_v51 }
  0xcb   : > { %v613_v18 = vadd.f32 %v612_v15, %v611_v14  ;;  %v639_v23 = vadd.f32 %v638_v21, %v629_v19  ;;  %v640_v24 = vsel %vm602_vm3, %v630_v20, 0.0 }
  0xcc   : > { %v738_v6 = vpop.permute.xlu1 %737  ;;  %v1852_v7 = vpop.permute.xlu0 %856 }
  0xcd   : > { %614 = vadd.xlane.f32.xlu2 %v613_v18  ;;  %v641_v25 = vadd.f32 %v640_v24, %v639_v23 }
  0xd1   : > { %918 = vperm.xlu0 %1437, %v912_v33  }
  0xd2   : > { %1440 = vset.pattern.permute.xlu1 %v1565_v1 }
  0xd3   : > { %779 = vperm.xlu1 %1440, %v761_v28  }
  0xd4   : > { %v743_v9 = vpop.permute.xlu1 %742  ;;  %v705_v10 = vpop.permute.xlu0 %704 }
  0xd5   : > { %642 = vadd.xlane.f32.xlu2 %v641_v25 }
  0xdb   : > { %923 = vperm.xlu1 %1440, %v913_v60  }
  0xdc   : > { %v796_v18 = vpop.permute.xlu1 %795 }
  0xed   : > { %714 = vperm.xlu2 %1432, %v596_v31  }
  0xf5   : > { %747 = vperm.xlu2 %1432, %v601_v34  }
  0xfd   : > { %1435 = vset.pattern.permute.xlu2 %v1567_v53  ;;  %v657_v53 = vsel %vm656_vm10, %v1442_v35, %v655_v56 }
  0xfe   : > { %852 = vperm.xlu2 %1435, %v1754_v30  }
 0x106   : > { %860 = vperm.xlu2 %1435, %v760_v27  }
 0x10e   : > { %1439 = vset.pattern.permute.xlu2 %v1565_v1 }
 0x10f   : > { %764 = vperm.xlu2 %1439, %v1754_v30  }
 0x123   : > { %v733_v27 = vpop.permute.xlu0 %732 }
 0x140   : > { %v615_v37 = vpop.xlane.xlu2 %614 }
 0x141   : > { %v616_v38 = vrot.slane %v615_v37, 4 }
 0x143   : > { %v617_v41 = vadd.f32 %v616_v38, %v615_v37  ;;  %v800_v38 = vpop.permute.xlu1 %799 }
 0x145   : > { %v618_v43 = vrot.slane %v617_v41, 2 }
 0x147   : > { %v619_v44 = vadd.f32 %v618_v43, %v617_v41 }
 0x148   : > { %v643_v46 = vpop.xlane.xlu2 %642 }
 0x149   : > { %v644_v47 = vrot.slane %v643_v46, 4  ;;  %v620_v48 = vrot.slane %v619_v44, 1 }
 0x14b   : > { %v645_v49 = vadd.f32 %v644_v47, %v643_v46  ;;  %v621_v50 = vadd.f32 %v620_v48, %v619_v44  ;;  %v720_v46 = vpop.permute.xlu0 %719 }
 0x14d   : > { %v646_v52 = vrot.slane %v645_v49, 2  ;;  %1349 = vpush %v621_v50 }
 0x14f   : > { %v647_v54 = vadd.f32 %v646_v52, %v645_v49 }
 0x150   : > { %v715_v8 = vpop.permute.xlu2 %714 }
 0x151   : > { %v648_v58 = vrot.slane %v647_v54, 1 }
 0x153   : > { %v649_v59 = vadd.f32 %v648_v58, %v647_v54  ;;  %v804_v54 = vpop.permute.xlu1 %803 }
 0x155   : > { %1351 = vpush %v649_v59 }
 0x156   : > { %1353 = vpush %v657_v53 }
 0x158   : > { %v1854_v14 = vpop.permute.xlu2 %747 }
 0x160   : > { %v853_v32 = vpop.permute.xlu2 %852 }
 0x17e   : > { %s1350_s23 = spop %1349 }
 0x186   : > { %s1352_s17 = spop %1351 }
 0x187   : > { %s1354_s24 = spop %1353 }
 0x188   : > { %s659_s30 = smul.f32 %s1354_s24, %s1350_s23 }
 0x189   : > { %s668_s15 = smul.f32 %s1354_s24, %s1352_s17  ;;  %s1569_s17 = smov 126  }
 0x18a   : > { %s669_s21 = smul.f32 %s659_s30, %s659_s30  ;;  %v684_v11 = vstv %s659_s30  ;;  %s1570_s24 = smov 124  }
 0x18b   : > { %v685_v15 = vsub.f32 %v1765_v36, %v684_v11  ;;  %v686_v16 = vsub.f32 %v1749_v29, %v684_v11  ;;  %v688_v21 = vsub.f32 %v1773_v40, %v684_v11  ;;  %v687_v22 = vsub.f32 %v1771_v39, %v684_v11 }
 0x18c   : > { %s670_s1 = ssub.f32 %s668_s15, %s669_s21  ;;  %v690_v39 = vsub.f32 %v1792_v57, %v684_v11  ;;  %v689_v40 = vsub.f32 %v1789_v55, %v684_v11  ;;  %v692_v37 = vsub.f32 %v1809_v13, %v684_v11  ;;  %v691_v53 = vsub.f32 %v1807_v12, %v684_v11 }
 0x18e   : > { %s671_s22 = sadd.f32 1e-08, %s670_s1 }
 0x190   : > { %v672_v61 = vstv %s671_s22 }
 0x191   : > { %1443 = vrsqrt.f32 %v672_v61  ;;  %vm679_vm12 = vweird.f32 %v672_v61 }
 0x197   : > { %v1444_v62 = vpop.eup %1443 }
 0x198   : > { %v674_v63 = vmul.f32 %v1444_v62, %v672_v61  ;;  %vm680_vm11 = vweird.f32 %v1444_v62  ;;  %v865_v61 = vpop.permute.xlu1 %864 }
 0x199   : > { %vm681_vm13 = vmor %vm679_vm12, %vm680_vm11 }
 0x19a   : > { %v675_v1 = vmul.f32 %v1444_v62, %v674_v63 }
 0x19c   : > { %v676_v0 = vmul.f32 0.5, %v675_v1 }
 0x19e   : > { %v677_v30 = vsub.f32 1.5, %v676_v0 }
 0x1a0   : > { %v678_v2 = vmul.f32 %v1444_v62, %v677_v30  ;;  %v861_v30 = vpop.permute.xlu2 %860 }
 0x1a2   : > { %v682_v3 = vsel %vm681_vm13, %v1444_v62, %v678_v2 }
 0x1a3   : > { %1355 = vpush %v682_v3 }
 0x1a8   : > { %v765_v11 = vpop.permute.xlu2 %764 }
 0x1d4   : > { %s1356_s23 = spop %1355 }
 0x1d5   : > { %v693_v17 = vstv %s1356_s23 }
 0x1d6   : > { %v694_v19 = vmul.f32 %v693_v17, %v685_v15  ;;  %v695_v20 = vmul.f32 %v693_v17, %v686_v16  ;;  %v697_v25 = vmul.f32 %v693_v17, %v688_v21  ;;  %v696_v26 = vmul.f32 %v693_v17, %v687_v22  ;;  %v770_v15 = vpop.permute.xlu0 %769  ;;  %v953_v21 = vld [vmem:[%s2062_s8] sm:$0xff] }
 0x1d7   : > { %v699_v43 = vmul.f32 %v693_v17, %v690_v39  ;;  %v698_v44 = vmul.f32 %v693_v17, %v689_v40  ;;  %v701_v45 = vmul.f32 %v693_v17, %v692_v37  ;;  %v700_v60 = vmul.f32 %v693_v17, %v691_v53  ;;  %v959_v17 = vld [vmem:[%s2063_s9 + $0x10] sm:$0xff] }
 0x1d8   : > { %v722_v23 = vmul.f32 %v705_v10, %v694_v19  ;;  %v723_v24 = vmul.f32 %v705_v10, %v695_v20  ;;  %v725_v33 = vmul.f32 %v710_v4, %v697_v25  ;;  %v724_v34 = vmul.f32 %v710_v4, %v696_v26  ;;  %v914_v4 = vld [vmem:[%s2061_s7 + $0x10] sm:$0xff]  ;;  %v960_v10 = vld [vmem:[%s2063_s9 + $0x18] sm:$0xff]  ;;  %v780_v19 = vpop.permute.xlu1 %779  ;;  %v1085_v25 = vld [vmem:[%s2065_s11] sm:$0xff] }
 0x1d9   : > { %v727_v49 = vmul.f32 %v715_v8, %v699_v43  ;;  %v726_v57 = vmul.f32 %v715_v8, %v698_v44  ;;  %v729_v50 = vmul.f32 %v720_v46, %v701_v45  ;;  %v728_v62 = vmul.f32 %v720_v46, %v700_v60  ;;  %v956_v8 = vld [vmem:[%s2062_s8 + $0x18] sm:$0xff] }
 0x1da   : > { %v1860_v28 = vadd.f32 %v733_v27, %v722_v23  ;;  %v751_v31 = vadd.f32 %v733_v27, %v723_v24  ;;  %v753_v41 = vadd.f32 %v738_v6, %v725_v33  ;;  %v1870_v42 = vadd.f32 %v738_v6, %v724_v34  ;;  %v1088_v34 = vld [vmem:[%s2065_s11 + $0x18] sm:$0xff] }
 0x1db   : > { %v755_v13 = vadd.f32 %v743_v9, %v727_v49  ;;  %v1877_v51 = vadd.f32 %v743_v9, %v726_v57  ;;  %v757_v52 = vadd.f32 %v1854_v14, %v729_v50  ;;  %v1891_v12 = vadd.f32 %v1854_v14, %v728_v62  ;;  %v955_v9 = vld [vmem:[%s2062_s8 + $0x10] sm:$0xff]  ;;  %v954_v14 = vld [vmem:[%s2062_s8 + $0x8] sm:$0xff] }
 0x1dc   : > { %v807_v36 = vmul.f32 %v792_v5, %v751_v31  ;;  %v806_v29 = vmul.f32 %v792_v5, %v1860_v28  ;;  %v867_v35 = vmul.f32 %v853_v32, %v1860_v28  ;;  %v809_v47 = vmul.f32 %v796_v18, %v753_v41 }
 0x1dd   : > { %v808_v48 = vmul.f32 %v796_v18, %v1870_v42  ;;  %v870_v55 = vmul.f32 %v1852_v7, %v753_v41  ;;  %v811_v56 = vmul.f32 %v800_v38, %v755_v13  ;;  %v810_v58 = vmul.f32 %v800_v38, %v1877_v51 }
 0x1de   : > { %824 = vrot.lane.b32.xlu2 %v807_v36, %s1569_s17  ;;  %822 = vrot.lane.b32.xlu1 %v806_v29, %s1569_s17  ;;  %v813_v59 = vmul.f32 %v804_v54, %v757_v52  ;;  %v869_v63 = vmul.f32 %v1852_v7, %v1870_v42  ;;  %v868_v1 = vmul.f32 %v853_v32, %v751_v31  ;;  %v915_v7 = vld [vmem:[%s2061_s7 + $0x18] sm:$0xff]  ;;  %v775_v18 = vpop.permute.xlu0 %774  ;;  %v1086_v32 = vld [vmem:[%s2065_s11 + $0x8] sm:$0xff] }
 0x1df   : > { %883 = vrot.lane.b32.xlu0 %v867_v35, %s1570_s24  ;;  %v874_v0 = vmul.f32 %v865_v61, %v757_v52  ;;  %v812_v2 = vmul.f32 %v804_v54, %v1891_v12  ;;  %v871_v3 = vmul.f32 %v861_v30, %v1877_v51  ;;  %v872_v5 = vmul.f32 %v861_v30, %v755_v13 }
 0x1e0   : > { %v873_v6 = vmul.f32 %v865_v61, %v1891_v12  ;;  %v924_v22 = vpop.permute.xlu1 %923  ;;  %v782_v41 = vmul.f32 %v765_v11, %v1860_v28  ;;  %v783_v43 = vmul.f32 %v770_v15, %v1870_v42  ;;  %v785_v52 = vmul.f32 %v780_v19, %v1891_v12 }
 0x1e1   : > { %v944_v53 = vstv %s1322_s16  ;;  %v784_v61 = vmul.f32 %v775_v18, %v1877_v51 }
 0x1e6   : > { %828 = vrot.lane.b32.xlu2 %v809_v47, %s1569_s17  ;;  %826 = vrot.lane.b32.xlu1 %v808_v48, %s1569_s17  ;;  %v919_v24 = vpop.permute.xlu0 %918 }
 0x1e7   : > { %889 = vrot.lane.b32.xlu0 %v870_v55, %s1570_s24 }
 0x1ee   : > { %832 = vrot.lane.b32.xlu2 %v811_v56, %s1569_s17  ;;  %830 = vrot.lane.b32.xlu1 %v810_v58, %s1569_s17 }
 0x1ef   : > { %836 = vrot.lane.b32.xlu0 %v813_v59, %s1569_s17 }
 0x1f6   : > { %887 = vrot.lane.b32.xlu2 %v869_v63, %s1570_s24  ;;  %885 = vrot.lane.b32.xlu1 %v868_v1, %s1570_s24 }
 0x1f7   : > { %897 = vrot.lane.b32.xlu0 %v874_v0, %s1570_s24 }
 0x1fe   : > { %834 = vrot.lane.b32.xlu2 %v812_v2, %s1569_s17  ;;  %891 = vrot.lane.b32.xlu1 %v871_v3, %s1570_s24 }
 0x206   : > { %893 = vrot.lane.b32.xlu2 %v872_v5, %s1570_s24  ;;  %928 = vperm.xlu1 %1440, %v914_v4  }
 0x20e   : > { %895 = vrot.lane.b32.xlu2 %v873_v6, %s1570_s24  ;;  %s1997_s24 = sand.u32 1, %s1554_s26  }
 0x20f   : > { %s1169_s4 = scalar_lea.sflag [#allocation3], %s1997_s24 }
 0x216   : > { %933 = vperm.xlu2 %1439, %v915_v7  }
 0x21e   : > { %1049 = vperm.xlu2 %1439, %v956_v8  }
 0x226   : > { %1044 = vperm.xlu2 %1439, %v955_v9  }
 0x22e   : > { %1073 = vperm.xlu2 %1439, %v960_v10  }
 0x236   : > { %1039 = vperm.xlu2 %1439, %v954_v14  }
 0x238   : > { %v825_v16 = vpop.permute.xlu2 %824 }
 0x23e   : > { %1068 = vperm.xlu2 %1439, %v959_v17  }
 0x240   : > { %v829_v20 = vpop.permute.xlu2 %828 }
 0x246   : > { %1034 = vperm.xlu2 %1439, %v953_v21  }
 0x248   : > { %v833_v23 = vpop.permute.xlu2 %832 }
 0x24e   : > { %1092 = vperm.xlu2 %1439, %v1085_v25   ;;  %v1089_v25 = vld [vmem:[%s2065_s11 + $0x20] sm:$0xff] }
 0x250   : > { %v823_v26 = vpop.permute.xlu1 %822  ;;  %v888_v27 = vpop.permute.xlu2 %887 }
 0x251   : > { %v884_v31 = vpop.permute.xlu0 %883  ;;  %v839_v37 = vsel %vm838_vm14, %v823_v26, %v825_v16  ;;  %v1571_v26 = vmov 4096.0  }
 0x252   : > { %v847_v46 = vadd.f32 %v839_v37, %v782_v41  ;;  %1445 = vrcp.f32 %v1571_v26 }
 0x256   : > { %1097 = vperm.xlu2 %1439, %v1086_v32  }
 0x258   : > { %v827_v36 = vpop.permute.xlu1 %826  ;;  %v835_v29 = vpop.permute.xlu2 %834 }
 0x259   : > { %v890_v33 = vpop.permute.xlu0 %889  ;;  %v840_v38 = vsel %vm838_vm14, %v827_v36, %v829_v20 }
 0x25a   : > { %v848_v47 = vadd.f32 %v840_v38, %v783_v43  ;;  %v901_v57 = vsel %vm899_vm15, %v888_v27, %v890_v33  ;;  %v1446_v27 = vpop.eup %1445 }
 0x25b   : > { %vm994_vm4 = vweird.f32 %v1446_v27 }
 0x25c   : > { %v909_v55 = vadd.f32 %v901_v57, %v848_v47 }
 0x25e   : > { %1107 = vperm.xlu2 %1439, %v1088_v34   ;;  %v937_v56 = vadd.f32 %v924_v22, %v909_v55  ;;  %v958_v22 = vld [vmem:[%s2063_s9 + $0x8] sm:$0xff] }
 0x260   : > { %v831_v35 = vpop.permute.xlu1 %830  ;;  %v894_v39 = vpop.permute.xlu2 %893  ;;  %v946_v12 = vmul.f32 %v944_v53, %v937_v56  ;;  %vm941_vm1 = vcmp.ge.f32.partialorder %v937_v56, 0.0 }
 0x261   : > { %v837_v40 = vpop.permute.xlu0 %836  ;;  %v841_v59 = vsel %vm838_vm14, %v831_v35, %v833_v23  ;;  %v957_v23 = vld [vmem:[%s2063_s9] sm:$0xff] }
 0x262   : > { %v842_v13 = vsel %vm838_vm14, %v835_v29, %v837_v40  ;;  %v849_v0 = vadd.f32 %v841_v59, %v784_v61  ;;  %v1947_v7 = vsel %vm941_vm1, %v937_v56, %v946_v12 }
 0x263   : > { %v850_v58 = vadd.f32 %v842_v13, %v785_v52  ;;  %v974_v10 = vmul.f32 %v1947_v7, %v1947_v7 }
 0x268   : > { %v886_v44 = vpop.permute.xlu1 %885  ;;  %v896_v45 = vpop.permute.xlu2 %895 }
 0x269   : > { %v900_v48 = vsel %vm899_vm15, %v884_v31, %v886_v44  ;;  %v898_v50 = vpop.permute.xlu0 %897  ;;  %v990_v31 = vmul.f32 4096.0, %v1446_v27 }
 0x26a   : > { %v908_v49 = vadd.f32 %v900_v48, %v847_v46  ;;  %v903_v42 = vsel %vm899_vm15, %v896_v45, %v898_v50 }
 0x26b   : > { %v911_v62 = vadd.f32 %v903_v42, %v850_v58  ;;  %v991_v29 = vsub.f32 1.0, %v990_v31 }
 0x26c   : > { %v936_v28 = vadd.f32 %v919_v24, %v908_v49  ;;  %v1087_v24 = vld [vmem:[%s2065_s11 + $0x10] sm:$0xff] }
 0x26d   : > { %v992_v37 = vmul.f32 %v1446_v27, %v991_v29 }
 0x26e   : > { %v945_v63 = vmul.f32 %v944_v53, %v936_v28  ;;  %vm940_vm0 = vcmp.ge.f32.partialorder %v936_v28, 0.0 }
 0x26f   : > { %v993_v45 = vadd.f32 %v1446_v27, %v992_v37 }
 0x270   : > { %v892_v54 = vpop.permute.xlu1 %891  ;;  %v934_v60 = vpop.permute.xlu2 %933  ;;  %v1945_v3 = vsel %vm940_vm0, %v936_v28, %v945_v63 }
 0x271   : > { %v902_v1 = vsel %vm899_vm15, %v892_v54, %v894_v39  ;;  %v939_v30 = vadd.f32 %v934_v60, %v911_v62  ;;  %v973_v51 = vmul.f32 %v1945_v3, %v1945_v3  ;;  %v961_v9 = vadd.f32 %v1947_v7, %v1945_v3 }
 0x272   : > { %v910_v2 = vadd.f32 %v902_v1, %v849_v0  ;;  %v995_v49 = vsel %vm994_vm4, %v1446_v27, %v993_v45 }
 0x273   : > { %v948_v5 = vmul.f32 %v944_v53, %v939_v30  ;;  %vm943_vm2 = vcmp.ge.f32.partialorder %v939_v30, 0.0  ;;  %v977_v17 = vadd.f32 %v974_v10, %v973_v51 }
 0x275   : > { %v1957_v14 = vsel %vm943_vm2, %v939_v30, %v948_v5 }
 0x276   : > { %v976_v19 = vmul.f32 %v1957_v14, %v1957_v14 }
 0x278   : > { %v929_v4 = vpop.permute.xlu1 %928  ;;  %v1050_v56 = vpop.permute.xlu2 %1049 }
 0x279   : > { %v938_v6 = vadd.f32 %v929_v4, %v910_v2 }
 0x27b   : > { %vm942_vm3 = vcmp.ge.f32.partialorder %v938_v6, 0.0  ;;  %v947_v8 = vmul.f32 %v944_v53, %v938_v6 }
 0x27d   : > { %v1955_v11 = vsel %vm942_vm3, %v938_v6, %v947_v8 }
 0x27e   : > { %v962_v15 = vadd.f32 %v961_v9, %v1955_v11  ;;  %v975_v16 = vmul.f32 %v1955_v11, %v1955_v11 }
 0x280   : > { %v963_v18 = vadd.f32 %v962_v15, %v1957_v14  ;;  %v978_v20 = vadd.f32 %v977_v17, %v975_v16  ;;  %v1045_v58 = vpop.permute.xlu2 %1044  ;;  %v1080_v17 = vld [vmem:[%s2064_s10] sm:$0xff] }
 0x282   : > { %964 = vadd.xlane.f32.xlu0 %v963_v18  ;;  %v979_v21 = vadd.f32 %v978_v20, %v976_v19  ;;  %v1083_v18 = vld [vmem:[%s2064_s10 + $0x18] sm:$0xff]  ;;  %v1081_v19 = vld [vmem:[%s2064_s10 + $0x8] sm:$0xff]  ;;  %v1084_v20 = vld [vmem:[%s2064_s10 + $0x20] sm:$0xff] }
 0x284   : > { %980 = vadd.xlane.f32.xlu1 %v979_v21  ;;  %v1082_v21 = vld [vmem:[%s2064_s10 + $0x10] sm:$0xff] }
 0x288   : > { %v1074_v59 = vpop.permute.xlu2 %1073 }
 0x290   : > { %v1040_v53 = vpop.permute.xlu2 %1039 }
 0x296   : > { %1063 = vperm.xlu0 %1437, %v958_v22  }
 0x298   : > { %v1069_v60 = vpop.permute.xlu2 %1068 }
 0x29d   : > { %1058 = vperm.xlu1 %1440, %v957_v23  }
 0x29e   : > { %1102 = vperm.xlu0 %1437, %v1087_v24  }
 0x2a0   : > { %v1035_v10 = vpop.permute.xlu2 %1034 }
 0x2a5   : > { %1112 = vperm.xlu1 %1440, %v1089_v25  }
 0x2a8   : > { %v1093_v22 = vpop.permute.xlu2 %1092 }
 0x2b0   : > { %v1098_v23 = vpop.permute.xlu2 %1097 }
 0x2b8   : > { %v1108_v24 = vpop.permute.xlu2 %1107 }
 0x2f5   : > { %v965_v32 = vpop.xlane.xlu0 %964 }
 0x2f6   : > { %v966_v36 = vrot.slane %v965_v32, 4 }
 0x2f7   : > { %v981_v33 = vpop.xlane.xlu1 %980 }
 0x2f8   : > { %v967_v34 = vadd.f32 %v966_v36, %v965_v32  ;;  %v982_v35 = vrot.slane %v981_v33, 4 }
 0x2fa   : > { %v968_v39 = vrot.slane %v967_v34, 2  ;;  %v983_v40 = vadd.f32 %v982_v35, %v981_v33 }
 0x2fc   : > { %v984_v38 = vrot.slane %v983_v40, 2  ;;  %v969_v41 = vadd.f32 %v968_v39, %v967_v34 }
 0x2fe   : > { %v970_v43 = vrot.slane %v969_v41, 1  ;;  %v985_v44 = vadd.f32 %v984_v38, %v983_v40 }
 0x300   : > { %v971_v46 = vadd.f32 %v970_v43, %v969_v41  ;;  %v986_v47 = vrot.slane %v985_v44, 1 }
 0x302   : > { %1357 = vpush %v971_v46  ;;  %v987_v48 = vadd.f32 %v986_v47, %v985_v44 }
 0x304   : > { %1359 = vpush %v987_v48 }
 0x305   : > { %1361 = vpush %v995_v49 }
 0x308   : > { %v1064_v16 = vpop.permute.xlu0 %1063 }
 0x333   : > { %s1358_s15 = spop %1357 }
 0x335   : > { %s1360_s16 = spop %1359 }
 0x336   : > { %s1362_s20 = spop %1361 }
 0x337   : > { %s997_s21 = smul.f32 %s1362_s20, %s1358_s15  ;;  %s1319_s15 = sshll.u32 %s1997_s24, 4 }
 0x338   : > { %s1006_s1 = smul.f32 %s1362_s20, %s1360_s16  ;;  %s1343_s20 = sshll.u32 %s1665_s29, 4 }
 0x339   : > { %s1007_s22 = smul.f32 %s997_s21, %s997_s21  ;;  %v1022_v61 = vstv %s997_s21  ;;  %s451_s21 = scalar_lea.vmem [#allocation5], %s1319_s15 }
 0x33a   : > { %v1024_v62 = vsub.f32 %v1947_v7, %v1022_v61  ;;  %v1025_v63 = vsub.f32 %v1955_v11, %v1022_v61  ;;  %v1026_v1 = vsub.f32 %v1957_v14, %v1022_v61  ;;  %v1023_v30 = vsub.f32 %v1945_v3, %v1022_v61  ;;  %v1059_v14 = vpop.permute.xlu1 %1058  ;;  %s1348_s16 = smul.u32 24, %s1997_s24 }
 0x33b   : > { %s1008_s23 = ssub.f32 %s1006_s1, %s1007_s22 }
 0x33c   : > { %s2002_s1 = scalar_lea.vmem [#allocation6], %s1348_s16 }
 0x33d   : > { %s1009_s17 = sadd.f32 1e-08, %s1008_s23 }
 0x33f   : > { %v1010_v57 = vstv %s1009_s17  ;;  %s1185_s17 = scalar_lea.hbm %s2066_s12, %s1343_s20 }
 0x340   : > { %1447 = vrsqrt.f32 %v1010_v57  ;;  %vm1017_vm6 = vweird.f32 %v1010_v57  ;;  %s1188_s0 = sshll.u32 %s1185_s17, 4  ;;  %s1484_s17 = scalar_lea.hbm %s2066_s12, 32  ;;  %s1189_s0 = int_to_ptr.hbm [resolvable:$true] %s1188_s0 }
 0x341   : > { %s1478_s22 = sshra.s32 %s1189_s0, 4  ;;  %s1479_s22 = int_to_ptr.hbm [resolvable:$true] %s1478_s22 }
 0x342   : > { %v1113_v32 = vpop.permute.xlu1 %1112  ;;  %s1480_s20 = scalar_lea.hbm %s1479_s22, 16  ;;  %p1485_p3 = scmp.lt.s32.totalorder %s1479_s22, %s2066_s12 }
 0x343   : > { %p1481_p0 = scmp.ne.s32.totalorder %s1479_s22, %s1480_s20  ;;  %p1486_p4 = scmp.lt.s32.totalorder %s1484_s17, %s1480_s20 }
 0x345   : > { %p1482_p1 = pnand %p1481_p0, %p1682_p5  ;;  %p1487_p7 = por %p1486_p4, %p1485_p3 }
 0x346   : > { %v1448_v55 = vpop.eup %1447 }
 0x347   : > { %v1012_v50 = vmul.f32 %v1448_v55, %v1010_v57  ;;  %vm1018_vm5 = vweird.f32 %v1448_v55  ;;  %p1483_p2 = pneg %p1482_p1 }
 0x348   : > { %vm1019_vm7 = vmor %vm1017_vm6, %vm1018_vm5 }
 0x349   : > { %v1013_v13 = vmul.f32 %v1448_v55, %v1012_v50  ;;  %p1488_p8 = pnand %p1487_p7, %p1483_p2 }
 0x34b   : > { %v1014_v52 = vmul.f32 0.5, %v1013_v13 }
 0x34d   : > { %v1015_v28 = vsub.f32 1.5, %v1014_v52 }
 0x34f   : > { %v1016_v42 = vmul.f32 %v1448_v55, %v1015_v28 }
 0x351   : > { %v1020_v54 = vsel %vm1019_vm7, %v1448_v55, %v1016_v42 }
 0x352   : > { %1363 = vpush %v1020_v54 }
 0x383   : > { %s1364_s30 = spop %1363 }
 0x384   : > { %v1027_v0 = vstv %s1364_s30  ;;  %s1186_s30 = sshll.u32 %s451_s21, 4  ;;  %s1187_s30 = int_to_ptr.vmem [resolvable:$true] %s1186_s30 }
 0x385   : > { %v1029_v12 = vmul.f32 %v1027_v0, %v1024_v62  ;;  %v1030_v2 = vmul.f32 %v1027_v0, %v1025_v63  ;;  %v1031_v4 = vmul.f32 %v1027_v0, %v1026_v1  ;;  %v1028_v5 = vmul.f32 %v1027_v0, %v1023_v30 }
 0x387   : > { %v1055_v6 = vmul.f32 %v1050_v56, %v1031_v4  ;;  %v1054_v51 = vmul.f32 %v1045_v58, %v1030_v2  ;;  %v1053_v9 = vmul.f32 %v1040_v53, %v1029_v12  ;;  %v1052_v7 = vmul.f32 %v1035_v10, %v1028_v5 }
 0x389   : > { %v1079_v8 = vadd.f32 %v1074_v59, %v1055_v6  ;;  %v1078_v15 = vadd.f32 %v1069_v60, %v1054_v51  ;;  %v1077_v11 = vadd.f32 %v1064_v16, %v1053_v9  ;;  %v1076_v3 = vadd.f32 %v1059_v14, %v1052_v7 }
 0x38b   : > { %1143 = vmatpush.msra.mxu2 %v1079_v8  ;;  %1344 = vmatpush.msra.mxu3 %v1079_v8 }
 0x38d   : > { %1144 = vmatpush.msra.mxu2 %v1078_v15  ;;  %1345 = vmatpush.msra.mxu3 %v1078_v15 }
 0x38f   : > { %1145 = vmatpush.msra.mxu2 %v1077_v11  ;;  %1346 = vmatpush.msra.mxu3 %v1077_v11 }
 0x391   : > { %1146 = vmatpush.msra.mxu2 %v1076_v3  ;;  %1347 = vmatpush.msra.mxu3 %v1076_v3 }
 0x392   : > { %1331 = vmatmul.msk.f32.vlgmr.msra.gmra.mxu2 %vm1115_vm8, %v1080_v17  ;;  %1334 = vmatmul.msk.f32.vlgmr.msra.gmra.mxu3 %vm1115_vm8, %v1083_v18 }
 0x39a   : > { %1332 = vmatmul.msk.f32.gmra.mxu2 %vm1115_vm8, %v1081_v19  ;;  %1335 = vmatmul.msk.f32.gmra.mxu3 %vm1115_vm8, %v1084_v20 }
 0x3a2   : > { %1333 = vmatmul.msk.f32.gmra.mxu2 %vm1115_vm8, %v1082_v21 }
 0x415   : > { %v1148_v25 = vpop.f32.mrf.mxu2  ;;  %v1157_v26 = vpop.f32.mrf.mxu3 }
 0x416   : > { %v1149_v27 = vadd.f32 %v1148_v25, %v1093_v22  ;;  %v1158_v31 = vadd.f32 %v1157_v26, %v1108_v24 }
 0x418   : > { %1163 = vst [vmem:[%s451_s21] sm:$0xff] %v1149_v27 }
 0x419   : > { %1166 = vst [vmem:[%s2002_s1 + $0x8] sm:$0xff] %v1158_v31 }
 0x41d   : > { %v1151_v36 = vpop.f32.mrf.mxu2  ;;  %v1160_v29 = vpop.f32.mrf.mxu3 }
 0x41e   : > { %v1152_v33 = vadd.f32 %v1151_v36, %v1098_v23  ;;  %v1161_v34 = vadd.f32 %v1160_v29, %v1113_v32 }
 0x420   : > { %1164 = vst [vmem:[%s451_s21 + $0x8] sm:$0xff] %v1152_v33 }
 0x421   : > { %1167 = vst [vmem:[%s2002_s1 + $0x10] sm:$0xff] %v1161_v34 }
 0x422   : > { %1491 = shalt.err (!%p1488_p8)
}
 0x423   : > { %s1572_s2 = smov 128   ;;  %s1573_s21 = smov 8   ;;  %v1103_v35 = vpop.permute.xlu0 %1102 }
 0x424   : > { %1370 = dma.vmem_to_hbm [thread:$0]  (%p1682_p5), %s1187_s30, 256, %s1189_s0, %s1169_s4, %s1572_s2, %s1572_s2, %s1573_s21  }
 0x425   : > { %s1203_s15 = sshll.u32 %s2002_s1, 4  ;;  %s1205_s16 = sshll.u32 %s1202_s3, 4  ;;  %v1154_v39 = vpop.f32.mrf.mxu2  ;;  %s1204_s15 = int_to_ptr.vmem [resolvable:$true] %s1203_s15  ;;  %s1206_s16 = int_to_ptr.hbm [resolvable:$true] %s1205_s16 }
 0x426   : > { %v1155_v40 = vadd.f32 %v1154_v39, %v1103_v35  ;;  %s1174_s5 = scalar_lea.sflag [#allocation7], %s1997_s24  ;;  %s1506_s6 = sshra.s32 %s1206_s16, 4  ;;  %s1507_s6 = int_to_ptr.hbm [resolvable:$true] %s1506_s6 }
 0x427   : > { %s1508_s22 = scalar_lea.hbm %s1507_s6, 24  ;;  %s1512_s0 = scalar_lea.hbm %s2067_s13, 48 }
 0x428   : > { %1165 = vst [vmem:[%s2002_s1] sm:$0xff] %v1155_v40  ;;  %p1509_p9 = scmp.ne.s32.totalorder %s1507_s6, %s1508_s22  ;;  %p1513_p12 = scmp.lt.s32.totalorder %s1507_s6, %s2067_s13 }
 0x429   : > { %p1514_p13 = scmp.lt.s32.totalorder %s1512_s0, %s1508_s22 }
 0x42a   : > { %p1510_p10 = pnand %p1509_p9, %p1682_p5 }
 0x42b   : > { %p1515_p0 = por %p1514_p13, %p1513_p12 }
 0x42c   : > { %p1511_p11 = pneg %p1510_p10 }
 0x42e   : > { %p1516_p1 = pnand %p1515_p0, %p1511_p11 }
 0x430   : > { %1519 = shalt.err (!%p1516_p1)
}
 0x431   : > { %1371 = dma.vmem_to_hbm [thread:$0]  (%p1682_p5), %s1204_s15, 384, %s1206_s16, %s1174_s5, %s1572_s2, %s1572_s2, %s1573_s21  }
 0x432 PF: > { %p1387_p2 = scmp.ge.s32.totalorder %s1562_s28, 2  ;;  %s1220_s24 = sand.u32 1, %s1550_s25  }
 0x433   : > { %s1221_s1 = scalar_lea.sflag [#allocation3], %s1220_s24 }
 0x434   : > { %p1379_p3 = pnand %p1387_p2, %p1686_p6 }
 0x436   : > { %p1380_p4 = pneg %p1379_p3 }
 0x438   : > { %1541 = dma.done.wait (%p1380_p4), %s1221_s1, 256  }
 0x439   : > { %1543 = vsyncadd (%p1380_p4), %s1221_s1, 4294967040  ;;  %s1231_s30 = scalar_lea.sflag [#allocation7], %s1220_s24 }
 0x43a   : > { %1545 = dma.done.wait (%p1380_p4), %s1231_s30, 384  }
 0x43b   : > { %1547 = vsyncadd (%p1380_p4), %s1231_s30, 4294966912  ;;  %s2085_s18 = sld [smem:[#allocation11_spill]]  ;;  %p28_p5 = scmp.ge.s32.totalorder %s1669_s14, 4  }
 0x43c   : > { %s2086_s25 = smov %s1554_s26  ;;  %s2087_s26 = smov %s1558_s27 }
 0x43d   : > { %s2089_s28 = smov %s1669_s14  ;;  %30 = sbr.rel (!%p28_p5) target bundleno = 14 (0xe), region = 125 }
 0x441   : > { %s2088_s27 = smov %s2085_s18 }
 0x442   :  { %1237 = vsyncpa [#allocation3], 1 }
 0x443   :  { %1239 = vsyncpa [#allocation3 + $0x1], 1 }
 0x444   :  { %1240 = vsyncpa [#allocation7], 1 }
 0x445   :  { %1242 = vsyncpa [#allocation7 + $0x1], 1 }
 0x446   :  { %1243 = vsyncpa [#allocation4], 1 }
 0x447   :  { %1245 = vsyncpa [#allocation4 + $0x1], 1 }

</bundles_post_ra>
